<compile_context>
chip_gen: v6e
topology: v6e:2x2x1
jax: 0.10.0
libtpu: 0.0.40
codegen_flags: <defaults>
</compile_context>

<pallas_src>
import functools

import jax
import jax.numpy as jnp
from jax.experimental import pallas as pl
from jax.experimental.pallas import tpu as pltpu


LANE = 128  # lane width: pad every output-feature dim to a multiple of this.


def _round_up(n, m):
    return ((n + m - 1) // m) * m


def _full_spec(shape):
    # Single block covering the whole (VMEM-resident) array; grid is ().
    return pl.BlockSpec(shape, lambda: (0,) * len(shape))


# ---------------------------------------------------------------------------
# Fused kernel: x -> [Linear (+BN) +ReLU] * layer_num -> Linear
# ---------------------------------------------------------------------------
def _fcs_fused_kernel(*refs, layer_num, do_bn, eps):
    """refs = (x, <per-layer params...>, w_out, b_out, o).

    per-layer params are (w, gamma, beta) when do_bn else (w, bias).
    All weights are already (F_in, F_out) and lane-padded.
    """
    per = 3 if do_bn else 2
    x_ref = refs[0]
    o_ref = refs[-1]

    h = x_ref[...]
    for i in range(layer_num):                      # static unroll (layer_num is small)
        base = 1 + i * per
        w = refs[base][...]
        z = jnp.dot(h, w, preferred_element_type=jnp.float32)
        if do_bn:
            g = refs[base + 1][...]                 # (1, F_out)
            bt = refs[base + 2][...]                # (1, F_out)
            # Linear bias is a no-op before batch-norm -> skipped entirely.
            mean = jnp.mean(z, axis=0, keepdims=True)
            c = z - mean
            var = jnp.mean(c * c, axis=0, keepdims=True)   # biased variance
            z = c * jax.lax.rsqrt(var + eps) * g + bt
        else:
            b = refs[base + 1][...]                 # (1, F_out)
            z = z + b
        h = jnp.maximum(z, 0.0)                     # ReLU; dropout p=0 -> identity

    w_out = refs[1 + layer_num * per][...]
    b_out = refs[2 + layer_num * per][...]
    o_ref[...] = jnp.dot(h, w_out, preferred_element_type=jnp.float32) + b_out


# ---------------------------------------------------------------------------
# One-time parameter packing: transpose + lane-pad (done once, outside the fwd)
# ---------------------------------------------------------------------------
def prepare_params(params, *, do_bn, batch_size):
    """Returns (flat_param_tuple, effective_do_bn, n_classes, out_pad)."""
    lin_layers, (w_out, b_out) = params
    do_bn = bool(do_bn) and batch_size > 1          # matches `if do_bn and x.shape[0] > 1`

    flat = []
    in_dim = lin_layers[0][0].shape[1]              # first layer K stays unpadded
    for (w, b, g, bt) in lin_layers:
        fout, fin = w.shape
        fout_p = _round_up(fout, LANE)
        w_t = jnp.zeros((in_dim, fout_p), jnp.float32).at[:fin, :fout].set(w.T)
        flat.append(w_t)
        if do_bn:
            flat.append(jnp.zeros((1, fout_p), jnp.float32).at[:, :fout].set(g))
            flat.append(jnp.zeros((1, fout_p), jnp.float32).at[:, :fout].set(bt))
        else:
            flat.append(jnp.zeros((1, fout_p), jnp.float32).at[:, :fout].set(b))
        in_dim = fout_p

    n_classes, fh = w_out.shape
    out_pad = _round_up(n_classes, LANE)
    flat.append(jnp.zeros((in_dim, out_pad), jnp.float32).at[:fh, :n_classes].set(w_out.T))
    flat.append(jnp.zeros((1, out_pad), jnp.float32).at[:, :n_classes].set(b_out))
    return tuple(flat), do_bn, n_classes, out_pad


# ---------------------------------------------------------------------------
# Forward
# ---------------------------------------------------------------------------
def fcs_block_forward(x, flat_params, *, layer_num, do_bn, n_classes, out_pad, eps=1e-5):
    B = x.shape[0]
    kernel = functools.partial(_fcs_fused_kernel,
                               layer_num=layer_num, do_bn=do_bn, eps=eps)
    args = (x,) + tuple(flat_params)
    y_pad = pl.pallas_call(
        kernel,
        out_shape=jax.ShapeDtypeStruct((B, out_pad), jnp.float32),
        in_specs=[_full_spec(a.shape) for a in args],
        out_specs=_full_spec((B, out_pad)),
        compiler_params=pltpu.CompilerParams(
            vmem_limit_bytes=32 * 1024 * 1024),      # safe on v5e/v6e/v7x
    )(*args)
    return y_pad[:, :n_classes]                      # drop lane padding outside the kernel


# ---------------------------------------------------------------------------
# Deterministic parameter init (PyTorch nn.Linear default: U(-1/sqrt(in), 1/sqrt(in)))
# ---------------------------------------------------------------------------
def init_params(key, layer_num, n_features, linears_hidden, n_classes):
    dims = [n_features] + list(linears_hidden)
    lin_layers = []
    for i in range(layer_num):
        fin, fout = dims[i], dims[i + 1]
        key, kw, kb = jax.random.split(key, 3)
        bound = 1.0 / (fin ** 0.5)
        w = jax.random.uniform(kw, (fout, fin), jnp.float32, -bound, bound)
        b = jax.random.uniform(kb, (fout,), jnp.float32, -bound, bound)
        gamma = jnp.ones((fout,), jnp.float32)   # BatchNorm1d init
        beta = jnp.zeros((fout,), jnp.float32)
        lin_layers.append((w, b, gamma, beta))
    fin, fout = dims[-1], n_classes
    key, kw, kb = jax.random.split(key, 3)
    bound = 1.0 / (fin ** 0.5)
    w_out = jax.random.uniform(kw, (fout, fin), jnp.float32, -bound, bound)
    b_out = jax.random.uniform(kb, (fout,), jnp.float32, -bound, bound)
    return lin_layers, (w_out, b_out)


# ---------------------------------------------------------------------------
# Pure-JAX reference (for correctness check) — exact PyTorch math, unpadded
# ---------------------------------------------------------------------------
def reference_forward(x, params, *, do_bn, eps=1e-5):
    lin_layers, (w_out, b_out) = params
    h = x
    for (w, b, g, bt) in lin_layers:
        h = h @ w.T + b
        if do_bn and h.shape[0] > 1:
            mean = h.mean(0, keepdims=True)
            var = ((h - mean) ** 2).mean(0, keepdims=True)
            h = (h - mean) / jnp.sqrt(var + eps) * g + bt
        h = jnp.maximum(h, 0.0)
    return h @ w_out.T + b_out


# ---------------------------------------------------------------------------
if __name__ == "__main__":
    # Small shapes consistent with the module.
    layer_num = 2
    n_features = 16
    linears_hidden = [32, 32]
    n_classes = 3
    batch = 4
    do_bn = True   # dropout = 0.0 (identity)

    key = jax.random.PRNGKey(0)
    key, kx = jax.random.split(key)
    x = jax.random.normal(kx, (batch, n_features), jnp.float32)

    params = init_params(key, layer_num, n_features, linears_hidden, n_classes)

    # One-time packing (transpose + lane padding) — not on the per-call path.
    flat_params, eff_do_bn, n_cls, out_pad = prepare_params(
        params, do_bn=do_bn, batch_size=batch)

    fwd = jax.jit(functools.partial(
        fcs_block_forward, layer_num=layer_num, do_bn=eff_do_bn,
        n_classes=n_cls, out_pad=out_pad))

    y = fwd(x, flat_params)
    y = jax.block_until_ready(y)

    y_ref = reference_forward(x, params, do_bn=do_bn)
    assert y.shape == (batch, n_classes)
    assert jnp.allclose(y, y_ref, atol=1e-5, rtol=1e-5), "mismatch vs reference"

    print("KERNEL_OK")
</pallas_src>

<mosaic_0001>
module attributes {stable_mosaic.version = 11 : i64} {
  func.func @_fcs_fused_kernel(%arg0: memref<4x16xf32, #tpu.memory_space<vmem>>, %arg1: memref<16x128xf32, #tpu.memory_space<vmem>>, %arg2: memref<1x128xf32, #tpu.memory_space<vmem>>, %arg3: memref<1x128xf32, #tpu.memory_space<vmem>>, %arg4: memref<128x128xf32, #tpu.memory_space<vmem>>, %arg5: memref<1x128xf32, #tpu.memory_space<vmem>>, %arg6: memref<1x128xf32, #tpu.memory_space<vmem>>, %arg7: memref<128x128xf32, #tpu.memory_space<vmem>>, %arg8: memref<1x128xf32, #tpu.memory_space<vmem>>, %arg9: memref<4x128xf32, #tpu.memory_space<vmem>>) attributes {dimension_semantics = [], scalar_prefetch = 0 : i64, scratch_operands = 0 : i64, tpu.core_type = #tpu.core_type<tc>} {
    %c0 = arith.constant 0 : index
    %c0_0 = arith.constant 0 : index
    %0 = vector.load %arg0[%c0, %c0_0] : memref<4x16xf32, #tpu.memory_space<vmem>>, vector<4x16xf32>
    %c0_1 = arith.constant 0 : index
    %c0_2 = arith.constant 0 : index
    %1 = vector.load %arg1[%c0_1, %c0_2] : memref<16x128xf32, #tpu.memory_space<vmem>>, vector<16x128xf32>
    %cst = arith.constant dense<0.000000e+00> : vector<4x128xf32>
    %2 = tpu.matmul %0, %1, %cst {dimension_numbers = #tpu.dot_dimension_numbers<[1], [0], [0], [1], [0, 0, 1, 1], [], []>} : vector<4x16xf32>, vector<16x128xf32>, vector<4x128xf32> -> vector<4x128xf32>
    %c0_3 = arith.constant 0 : index
    %c0_4 = arith.constant 0 : index
    %3 = vector.load %arg2[%c0_3, %c0_4] : memref<1x128xf32, #tpu.memory_space<vmem>>, vector<1x128xf32>
    %c0_5 = arith.constant 0 : index
    %c0_6 = arith.constant 0 : index
    %4 = vector.load %arg3[%c0_5, %c0_6] : memref<1x128xf32, #tpu.memory_space<vmem>>, vector<1x128xf32>
    %cst_7 = arith.constant dense<0.000000e+00> : vector<128xf32>
    %5 = vector.multi_reduction <add>, %2, %cst_7 [0] : vector<4x128xf32> to vector<128xf32>
    %6 = vector.shape_cast %5 : vector<128xf32> to vector<1x128xf32>
    %cst_8 = arith.constant 4.000000e+00 : f32
    %7 = vector.broadcast %cst_8 : f32 to vector<1x128xf32>
    %8 = arith.divf %6, %7 : vector<1x128xf32>
    %9 = vector.broadcast %8 : vector<1x128xf32> to vector<4x128xf32>
    %10 = arith.subf %2, %9 : vector<4x128xf32>
    %11 = arith.mulf %10, %10 : vector<4x128xf32>
    %cst_9 = arith.constant dense<0.000000e+00> : vector<128xf32>
    %12 = vector.multi_reduction <add>, %11, %cst_9 [0] : vector<4x128xf32> to vector<128xf32>
    %13 = vector.shape_cast %12 : vector<128xf32> to vector<1x128xf32>
    %cst_10 = arith.constant 4.000000e+00 : f32
    %14 = vector.broadcast %cst_10 : f32 to vector<1x128xf32>
    %15 = arith.divf %13, %14 : vector<1x128xf32>
    %cst_11 = arith.constant 9.99999974E-6 : f32
    %16 = vector.broadcast %cst_11 : f32 to vector<1x128xf32>
    %17 = arith.addf %15, %16 : vector<1x128xf32>
    %18 = math.rsqrt %17 : vector<1x128xf32>
    %19 = vector.broadcast %18 : vector<1x128xf32> to vector<4x128xf32>
    %20 = arith.mulf %10, %19 : vector<4x128xf32>
    %21 = vector.broadcast %3 : vector<1x128xf32> to vector<4x128xf32>
    %22 = arith.mulf %20, %21 : vector<4x128xf32>
    %23 = vector.broadcast %4 : vector<1x128xf32> to vector<4x128xf32>
    %24 = arith.addf %22, %23 : vector<4x128xf32>
    %cst_12 = arith.constant 0.000000e+00 : f32
    %25 = vector.broadcast %cst_12 : f32 to vector<4x128xf32>
    %26 = arith.maximumf %24, %25 : vector<4x128xf32>
    %c0_13 = arith.constant 0 : index
    %c0_14 = arith.constant 0 : index
    %27 = vector.load %arg4[%c0_13, %c0_14] : memref<128x128xf32, #tpu.memory_space<vmem>>, vector<128x128xf32>
    %cst_15 = arith.constant dense<0.000000e+00> : vector<4x128xf32>
    %28 = tpu.matmul %26, %27, %cst_15 {dimension_numbers = #tpu.dot_dimension_numbers<[1], [0], [0], [1], [0, 0, 1, 1], [], []>} : vector<4x128xf32>, vector<128x128xf32>, vector<4x128xf32> -> vector<4x128xf32>
    %c0_16 = arith.constant 0 : index
    %c0_17 = arith.constant 0 : index
    %29 = vector.load %arg5[%c0_16, %c0_17] : memref<1x128xf32, #tpu.memory_space<vmem>>, vector<1x128xf32>
    %c0_18 = arith.constant 0 : index
    %c0_19 = arith.constant 0 : index
    %30 = vector.load %arg6[%c0_18, %c0_19] : memref<1x128xf32, #tpu.memory_space<vmem>>, vector<1x128xf32>
    %cst_20 = arith.constant dense<0.000000e+00> : vector<128xf32>
    %31 = vector.multi_reduction <add>, %28, %cst_20 [0] : vector<4x128xf32> to vector<128xf32>
    %32 = vector.shape_cast %31 : vector<128xf32> to vector<1x128xf32>
    %cst_21 = arith.constant 4.000000e+00 : f32
    %33 = vector.broadcast %cst_21 : f32 to vector<1x128xf32>
    %34 = arith.divf %32, %33 : vector<1x128xf32>
    %35 = vector.broadcast %34 : vector<1x128xf32> to vector<4x128xf32>
    %36 = arith.subf %28, %35 : vector<4x128xf32>
    %37 = arith.mulf %36, %36 : vector<4x128xf32>
    %cst_22 = arith.constant dense<0.000000e+00> : vector<128xf32>
    %38 = vector.multi_reduction <add>, %37, %cst_22 [0] : vector<4x128xf32> to vector<128xf32>
    %39 = vector.shape_cast %38 : vector<128xf32> to vector<1x128xf32>
    %cst_23 = arith.constant 4.000000e+00 : f32
    %40 = vector.broadcast %cst_23 : f32 to vector<1x128xf32>
    %41 = arith.divf %39, %40 : vector<1x128xf32>
    %cst_24 = arith.constant 9.99999974E-6 : f32
    %42 = vector.broadcast %cst_24 : f32 to vector<1x128xf32>
    %43 = arith.addf %41, %42 : vector<1x128xf32>
    %44 = math.rsqrt %43 : vector<1x128xf32>
    %45 = vector.broadcast %44 : vector<1x128xf32> to vector<4x128xf32>
    %46 = arith.mulf %36, %45 : vector<4x128xf32>
    %47 = vector.broadcast %29 : vector<1x128xf32> to vector<4x128xf32>
    %48 = arith.mulf %46, %47 : vector<4x128xf32>
    %49 = vector.broadcast %30 : vector<1x128xf32> to vector<4x128xf32>
    %50 = arith.addf %48, %49 : vector<4x128xf32>
    %cst_25 = arith.constant 0.000000e+00 : f32
    %51 = vector.broadcast %cst_25 : f32 to vector<4x128xf32>
    %52 = arith.maximumf %50, %51 : vector<4x128xf32>
    %c0_26 = arith.constant 0 : index
    %c0_27 = arith.constant 0 : index
    %53 = vector.load %arg7[%c0_26, %c0_27] : memref<128x128xf32, #tpu.memory_space<vmem>>, vector<128x128xf32>
    %c0_28 = arith.constant 0 : index
    %c0_29 = arith.constant 0 : index
    %54 = vector.load %arg8[%c0_28, %c0_29] : memref<1x128xf32, #tpu.memory_space<vmem>>, vector<1x128xf32>
    %cst_30 = arith.constant dense<0.000000e+00> : vector<4x128xf32>
    %55 = tpu.matmul %52, %53, %cst_30 {dimension_numbers = #tpu.dot_dimension_numbers<[1], [0], [0], [1], [0, 0, 1, 1], [], []>} : vector<4x128xf32>, vector<128x128xf32>, vector<4x128xf32> -> vector<4x128xf32>
    %56 = vector.broadcast %54 : vector<1x128xf32> to vector<4x128xf32>
    %57 = arith.addf %55, %56 : vector<4x128xf32>
    %c0_31 = arith.constant 0 : index
    %c0_32 = arith.constant 0 : index
    %58 = vector.load %arg9[%c0_31, %c0_32] : memref<4x128xf32, #tpu.memory_space<vmem>>, vector<4x128xf32>
    tpu.vector_store %arg9[%c0_31, %c0_32], %57 {strides = array<i32>} : memref<4x128xf32, #tpu.memory_space<vmem>>, vector<4x128xf32>,
    return
  }
}

</mosaic_0001>

<bundles_post_ra>
// kernel: fcs_block_forward.1
= control target key start
LH: loop header
LB: loop body
LE: loop exit
PB: predicated region body
PF: predicated region fallthrough
CT: control target
= control target key end

     0   :  { %14 = vsyncpa [#allocation3], 0  ;;  %s818_s0 = inlined_call_operand.hbm [shape: f32[4,16], index: 0, kind: input, shape index: {}]   ;;  %s819_s1 = inlined_call_operand.hbm [shape: f32[16,128], index: 1, kind: input, shape index: {}]   ;;  %s820_s2 = inlined_call_operand.vmem [shape: f32[1,128], index: 2, kind: input, shape index: {}]   ;;  %s821_s3 = inlined_call_operand.vmem [shape: f32[1,128], index: 3, kind: input, shape index: {}]   ;;  %s822_s4 = inlined_call_operand.hbm [shape: f32[128,128], index: 4, kind: input, shape index: {}]   ;;  %s823_s5 = inlined_call_operand.vmem [shape: f32[1,128], index: 5, kind: input, shape index: {}]   ;;  %s824_s6 = inlined_call_operand.vmem [shape: f32[1,128], index: 6, kind: input, shape index: {}]   ;;  %s825_s7 = inlined_call_operand.hbm [shape: f32[128,128], index: 7, kind: input, shape index: {}]   ;;  %s826_s8 = inlined_call_operand.vmem [shape: f32[1,128], index: 8, kind: input, shape index: {}]   ;;  %s827_s9 = inlined_call_operand.hbm [shape: f32[4,128], index: 9, kind: output, shape index: {}]  }
   0x1   :  { %15 = vsyncpa [#allocation6], 0 }
   0x2   :  { %16 = vsyncpa [#allocation9], 0 }
   0x3   :  { %17 = vsyncpa [#allocation4], 0  ;;  %s679_s30 = smov [#allocation5]  }
   0x4   :  { %s33_s10 = sshll.u32 %s679_s30, 4  ;;  %s34_s10 = int_to_ptr.vmem [resolvable:$true] %s33_s10 }
   0x5   :  { %s579_s11 = scalar_lea.vmem %s34_s10, 256  ;;  %p584_p1 = scmp.lt.s32.totalorder %s34_s10, %s34_s10 }
   0x6   :  { %p580_p0 = scmp.ne.s32.totalorder %s34_s10, %s579_s11  ;;  %p585_p2 = scmp.lt.s32.totalorder %s579_s11, %s579_s11 }
   0x8   :  { %p586_p3 = por %p585_p2, %p584_p1 }
   0xa   :  { %p587_p4 = pnand %p586_p3, %p580_p0 }
   0xc   :  { %590 = shalt.err (!%p587_p4)
}
   0xd   :  { %s680_s12 = smov 128   ;;  %s681_s13 = smov 8  }
   0xe   :  { %39 = dma.hbm_to_vmem [thread:$0]  %s819_s1, 256, %s34_s10, [#allocation6], %s680_s12, %s680_s12, %s681_s13  }
   0xf   :  { %s682_s16 = smov [#allocation2]   ;;  %s683_s18 = smov [#allocation7]  }
  0x10   :  { %s24_s17 = sshll.u32 %s682_s16, 4  ;;  %s49_s19 = sshll.u32 %s683_s18, 4  ;;  %s25_s17 = int_to_ptr.vmem [resolvable:$true] %s24_s17  ;;  %s50_s19 = int_to_ptr.vmem [resolvable:$true] %s49_s19 }
  0x11   :  { %s599_s20 = scalar_lea.vmem %s25_s17, 64  ;;  %p604_p6 = scmp.lt.s32.totalorder %s25_s17, %s25_s17 }
  0x12   :  { %p600_p5 = scmp.ne.s32.totalorder %s25_s17, %s599_s20  ;;  %p605_p7 = scmp.lt.s32.totalorder %s599_s20, %s599_s20 }
  0x14   :  { %p606_p8 = por %p605_p7, %p604_p6 }
  0x16   :  { %p607_p9 = pnand %p606_p8, %p600_p5 }
  0x18   :  { %610 = shalt.err (!%p607_p9)
}
  0x19   :  { %27 = dma.hbm_to_vmem [thread:$0]  %s818_s0, 64, %s25_s17, [#allocation3]  }
  0x1a   :  { %s619_s23 = scalar_lea.vmem %s50_s19, 2048  ;;  %p624_p11 = scmp.lt.s32.totalorder %s50_s19, %s50_s19 }
  0x1b   :  { %p620_p10 = scmp.ne.s32.totalorder %s50_s19, %s619_s23  ;;  %p625_p12 = scmp.lt.s32.totalorder %s619_s23, %s619_s23 }
  0x1d   :  { %p626_p13 = por %p625_p12, %p624_p11 }
  0x1f   :  { %p627_p0 = pnand %p626_p13, %p620_p10 }
  0x21   :  { %630 = shalt.err (!%p627_p0)
}
  0x22   :  { %55 = dma.hbm_to_vmem [thread:$0]  %s822_s4, 2048, %s50_s19, [#allocation6], %s680_s12, %s680_s12, %s681_s13  }
  0x23   :  { %s684_s25 = smov [#allocation8]  }
  0x24   :  { %s65_s26 = sshll.u32 %s684_s25, 4  ;;  %s66_s26 = int_to_ptr.vmem [resolvable:$true] %s65_s26 }
  0x25   :  { %s639_s27 = scalar_lea.vmem %s66_s26, 2048  ;;  %p644_p2 = scmp.lt.s32.totalorder %s66_s26, %s66_s26 }
  0x26   :  { %p640_p1 = scmp.ne.s32.totalorder %s66_s26, %s639_s27  ;;  %p645_p3 = scmp.lt.s32.totalorder %s639_s27, %s639_s27 }
  0x28   :  { %p646_p4 = por %p645_p3, %p644_p2 }
  0x2a   :  { %p647_p5 = pnand %p646_p4, %p640_p1 }
  0x2c   :  { %650 = shalt.err (!%p647_p5)
}
  0x2d   :  { %71 = dma.hbm_to_vmem [thread:$0]  %s825_s7, 2048, %s66_s26, [#allocation9], %s680_s12, %s680_s12, %s681_s13  }
  0x2e   :  { %671 = dma.done.wait [#allocation3], 64  }
  0x2f   :  { %672 = vsyncadd [#allocation3], 4294967232 }
  0x30   :  { %673 = dma.done.wait [#allocation6], 2304  }
  0x31   :  { %674 = vsyncadd [#allocation6], 4294964992 }
  0x32   :  { %675 = dma.done.wait [#allocation9], 2048  }
  0x33   :  { %676 = vsyncadd [#allocation9], 4294965248  ;;  %v685_v0 = vmov 0.0   ;;  %vm686_vm0 = vmmov 0   ;;  %v88_v1 = vld [vmem:[#allocation5 + $0x8] sm:$0xff]  ;;  %v87_v2 = vld [vmem:[#allocation5] sm:$0xff] }
  0x34   :  { %481 = vmatprep.subr.mxu0 %v685_v0  ;;  %485 = vmatprep.mubr.msk.f32.mxu0 %vm686_vm0, %v685_v0  ;;  %v86_v3 = vld [vmem:[#allocation2] sm:$0xf]  ;;  %vm89_vm1 = vcmask 130048   ;;  %v218_v4 = vld [vmem:[#allocation7 + $0x78] sm:$0xff]  ;;  %v217_v5 = vld [vmem:[#allocation7 + $0x70] sm:$0xff]  ;;  %vm165_vm2 = vcmask 1043456  }
  0x35   :  { %488 = vmatprep.subr.mxu1 %v685_v0  ;;  %520 = vmatprep.mubr.msk.f32.mxu1 %vm686_vm0, %v685_v0  ;;  %v216_v6 = vld [vmem:[#allocation7 + $0x68] sm:$0xff]  ;;  %v215_v7 = vld [vmem:[#allocation7 + $0x60] sm:$0xff]  ;;  %v214_v8 = vld [vmem:[#allocation7 + $0x58] sm:$0xff]  ;;  %s687_s14 = smov [#allocation10]  }
  0x36   :  { %482 = vmatpush3.msra.mxu0 %v88_v1  ;;  %489 = vmatpush3.msra.mxu1 %v218_v4  ;;  %v213_v9 = vld [vmem:[#allocation7 + $0x50] sm:$0xff]  ;;  %v212_v10 = vld [vmem:[#allocation7 + $0x48] sm:$0xff]  ;;  %v211_v11 = vld [vmem:[#allocation7 + $0x40] sm:$0xff]  ;;  %s427_s15 = sshll.u32 %s687_s14, 4  ;;  %s428_s15 = int_to_ptr.vmem [resolvable:$true] %s427_s15 }
  0x37   :  { %483 = vmatprep.subr.mxu0 %v685_v0  ;;  %490 = vmatprep.subr.mxu1 %v685_v0  ;;  %v210_v12 = vld [vmem:[#allocation7 + $0x38] sm:$0xff]  ;;  %v209_v13 = vld [vmem:[#allocation7 + $0x30] sm:$0xff]  ;;  %v208_v14 = vld [vmem:[#allocation7 + $0x28] sm:$0xff]  ;;  %p656_p7 = scmp.lt.s32.totalorder %s428_s15, %s428_s15 }
  0x38   :  { %484 = vmatpush3.msra.mxu0 %v87_v2  ;;  %491 = vmatpush3.msra.mxu1 %v217_v5  ;;  %v207_v15 = vld [vmem:[#allocation7 + $0x20] sm:$0xff]  ;;  %v206_v16 = vld [vmem:[#allocation7 + $0x18] sm:$0xff]  ;;  %v205_v17 = vld [vmem:[#allocation7 + $0x10] sm:$0xff] }
  0x39   :  { %486 = vmatmul.mubr.msk.f32.vlgmr.msra.gmra.mxu0 %vm89_vm1, %v86_v3  ;;  %523 = vmatprep.subr.mxu0 %v685_v0  ;;  %v204_v18 = vld [vmem:[#allocation7 + $0x8] sm:$0xff]  ;;  %v203_v19 = vld [vmem:[#allocation7] sm:$0xff]  ;;  %v342_v48 = vld [vmem:[#allocation8 + $0x78] sm:$0xff] }
  0x3a   :  { %555 = vmatprep.mubr.msk.f32.mxu0 %vm686_vm0, %v685_v0  ;;  %492 = vmatprep.subr.mxu1 %v685_v0  ;;  %v439_v42 = vld [vmem:[%s820_s2] ss:$0 sm:$0xff]  ;;  %v341_v49 = vld [vmem:[#allocation8 + $0x70] sm:$0xff]  ;;  %v339_v51 = vld [vmem:[#allocation8 + $0x60] sm:$0xff] }
  0x3b   :  { %493 = vmatpush3.msra.mxu1 %v216_v6  ;;  %v440_v44 = vld [vmem:[%s821_s3] ss:$0 sm:$0xff]  ;;  %524 = vmatpush3.msra.mxu0 %v342_v48  ;;  %v338_v52 = vld [vmem:[#allocation8 + $0x58] sm:$0xff]  ;;  %v337_v53 = vld [vmem:[#allocation8 + $0x50] sm:$0xff] }
  0x3c   :  { %494 = vmatprep.subr.mxu1 %v685_v0  ;;  %525 = vmatprep.subr.mxu0 %v685_v0  ;;  %v340_v50 = vld [vmem:[#allocation8 + $0x68] sm:$0xff]  ;;  %v335_v55 = vld [vmem:[#allocation8 + $0x40] sm:$0xff]  ;;  %v334_v56 = vld [vmem:[#allocation8 + $0x38] sm:$0xff] }
  0x3d   :  { %495 = vmatpush3.msra.mxu1 %v215_v7  ;;  %526 = vmatpush3.msra.mxu0 %v341_v49  ;;  %v336_v54 = vld [vmem:[#allocation8 + $0x48] sm:$0xff]  ;;  %v333_v57 = vld [vmem:[#allocation8 + $0x30] sm:$0xff]  ;;  %v331_v59 = vld [vmem:[#allocation8 + $0x20] sm:$0xff] }
  0x3e   :  { %496 = vmatprep.subr.mxu1 %v685_v0  ;;  %527 = vmatprep.subr.mxu0 %v685_v0  ;;  %v332_v58 = vld [vmem:[#allocation8 + $0x28] sm:$0xff]  ;;  %v330_v60 = vld [vmem:[#allocation8 + $0x18] sm:$0xff]  ;;  %v329_v61 = vld [vmem:[#allocation8 + $0x10] sm:$0xff] }
  0x3f   :  { %497 = vmatpush3.msra.mxu1 %v214_v8  ;;  %528 = vmatpush3.msra.mxu0 %v340_v50  ;;  %v328_v62 = vld [vmem:[#allocation8 + $0x8] sm:$0xff]  ;;  %v327_v63 = vld [vmem:[#allocation8] sm:$0xff] }
  0x40   :  { %498 = vmatprep.subr.mxu1 %v685_v0  ;;  %529 = vmatprep.subr.mxu0 %v685_v0 }
  0x41   :  { %499 = vmatpush3.msra.mxu1 %v213_v9  ;;  %530 = vmatpush3.msra.mxu0 %v339_v51 }
  0x42   :  { %500 = vmatprep.subr.mxu1 %v685_v0  ;;  %531 = vmatprep.subr.mxu0 %v685_v0 }
  0x43   :  { %501 = vmatpush3.msra.mxu1 %v212_v10  ;;  %532 = vmatpush3.msra.mxu0 %v338_v52 }
  0x44   :  { %502 = vmatprep.subr.mxu1 %v685_v0  ;;  %533 = vmatprep.subr.mxu0 %v685_v0 }
  0x45   :  { %503 = vmatpush3.msra.mxu1 %v211_v11  ;;  %534 = vmatpush3.msra.mxu0 %v337_v53 }
  0x46   :  { %504 = vmatprep.subr.mxu1 %v685_v0  ;;  %535 = vmatprep.subr.mxu0 %v685_v0 }
  0x47   :  { %505 = vmatpush3.msra.mxu1 %v210_v12  ;;  %536 = vmatpush3.msra.mxu0 %v336_v54 }
  0x48   :  { %506 = vmatprep.subr.mxu1 %v685_v0  ;;  %537 = vmatprep.subr.mxu0 %v685_v0 }
  0x49   :  { %507 = vmatpush3.msra.mxu1 %v209_v13  ;;  %538 = vmatpush3.msra.mxu0 %v335_v55 }
  0x4a   :  { %508 = vmatprep.subr.mxu1 %v685_v0  ;;  %539 = vmatprep.subr.mxu0 %v685_v0 }
  0x4b   :  { %509 = vmatpush3.msra.mxu1 %v208_v14  ;;  %540 = vmatpush3.msra.mxu0 %v334_v56 }
  0x4c   :  { %510 = vmatprep.subr.mxu1 %v685_v0  ;;  %541 = vmatprep.subr.mxu0 %v685_v0 }
  0x4d   :  { %511 = vmatpush3.msra.mxu1 %v207_v15  ;;  %542 = vmatpush3.msra.mxu0 %v333_v57 }
  0x4e   :  { %512 = vmatprep.subr.mxu1 %v685_v0  ;;  %543 = vmatprep.subr.mxu0 %v685_v0 }
  0x4f   :  { %513 = vmatpush3.msra.mxu1 %v206_v16  ;;  %544 = vmatpush3.msra.mxu0 %v332_v58 }
  0x50   :  { %514 = vmatprep.subr.mxu1 %v685_v0  ;;  %545 = vmatprep.subr.mxu0 %v685_v0 }
  0x51   :  { %515 = vmatpush3.msra.mxu1 %v205_v17  ;;  %546 = vmatpush3.msra.mxu0 %v331_v59 }
  0x52   :  { %516 = vmatprep.subr.mxu1 %v685_v0  ;;  %547 = vmatprep.subr.mxu0 %v685_v0 }
  0x53   :  { %517 = vmatpush3.msra.mxu1 %v204_v18  ;;  %548 = vmatpush3.msra.mxu0 %v330_v60 }
  0x54   :  { %518 = vmatprep.subr.mxu1 %v685_v0  ;;  %549 = vmatprep.subr.mxu0 %v685_v0 }
  0x55   :  { %519 = vmatpush3.msra.mxu1 %v203_v19  ;;  %550 = vmatpush3.msra.mxu0 %v329_v61 }
  0x56   :  { %551 = vmatprep.subr.mxu0 %v685_v0 }
  0x57   :  { %552 = vmatpush3.msra.mxu0 %v328_v62 }
  0x58   :  { %553 = vmatprep.subr.mxu0 %v685_v0 }
  0x59   :  { %554 = vmatpush3.msra.mxu0 %v327_v63 }
  0xf9   :  { %v159_v20 = vpop.f32.mrf.mxu0 }
  0xfa   :  { %v166_v21 = vsel %vm165_vm2, %v159_v20, 0.0 }
  0xfb   :  { %v167_v22 = vrot.slane %v166_v21, 4  ;;  %v487_v23 = vpop.f32.mrf.mxu0 }
  0xfd   :  { %v168_v24 = vadd.f32 %v167_v22, %v166_v21  ;;  %v441_v22 = vld [vmem:[%s823_s5] ss:$0 sm:$0xff]  ;;  %s651_s5 = scalar_lea.vmem %s428_s15, 64 }
  0xfe   :  { %p652_p6 = scmp.ne.s32.totalorder %s428_s15, %s651_s5  ;;  %p657_p8 = scmp.lt.s32.totalorder %s651_s5, %s651_s5 }
  0xff   :  { %v169_v25 = vrot.slane %v168_v24, 2 }
 0x100   :  { %p658_p9 = por %p657_p8, %p656_p7 }
 0x101   :  { %v170_v26 = vadd.f32 %v169_v25, %v168_v24  ;;  %v442_v24 = vld [vmem:[%s824_s6] ss:$0 sm:$0xff] }
 0x102   :  { %p659_p10 = pnand %p658_p9, %p652_p6 }
 0x103   :  { %v171_v27 = vrot.slane %v170_v26, 1 }
 0x105   :  { %v172_v28 = vadd.f32 %v171_v27, %v170_v26 }
 0x107   :  { %v174_v29 = vmul.f32 0.25, %v172_v28  ;;  %v443_v28 = vld [vmem:[%s826_s8] ss:$0 sm:$0xff] }
 0x109   :  { %v175_v30 = vsub.f32 %v159_v20, %v174_v29 }
 0x10b   :  { %v176_v31 = vmul.f32 %v175_v30, %v175_v30 }
 0x10d   :  { %v177_v32 = vsel %vm165_vm2, %v176_v31, 0.0 }
 0x10e   :  { %v178_v33 = vrot.slane %v177_v32, 4 }
 0x110   :  { %v179_v34 = vadd.f32 %v178_v33, %v177_v32 }
 0x112   :  { %v180_v35 = vrot.slane %v179_v34, 2 }
 0x114   :  { %v181_v36 = vadd.f32 %v180_v35, %v179_v34 }
 0x116   :  { %v182_v37 = vrot.slane %v181_v36, 1 }
 0x118   :  { %v183_v38 = vadd.f32 %v182_v37, %v181_v36 }
 0x11a   :  { %v184_v39 = vmul.f32 0.25, %v183_v38 }
 0x11c   :  { %v185_v40 = vadd.f32 1e-05, %v184_v39 }
 0x11e   :  { %567 = vrsqrt.f32 %v185_v40 }
 0x12b   :  { %v568_v41 = vpop.eup %567 }
 0x12c   :  { %v187_v43 = vmul.f32 %v568_v41, %v175_v30 }
 0x12e   :  { %v194_v45 = vmul.f32 %v439_v42, %v187_v43 }
 0x130   :  { %v201_v46 = vadd.f32 %v440_v44, %v194_v45 }
 0x132   :  { %v202_v47 = vmax.f32 %v201_v46, 0.0 }
 0x134   :  { %521 = vmatmul.mubr.f32.vlgmr.msra.gmra.mxu1 %v202_v47 }
 0x1f4   :  { %v285_v1 = vpop.f32.mrf.mxu1 }
 0x1f5   :  { %v291_v2 = vsel %vm165_vm2, %v285_v1, 0.0 }
 0x1f6   :  { %v292_v3 = vrot.slane %v291_v2, 4  ;;  %v522_v4 = vpop.f32.mrf.mxu1 }
 0x1f8   :  { %v293_v5 = vadd.f32 %v292_v3, %v291_v2 }
 0x1fa   :  { %v294_v6 = vrot.slane %v293_v5, 2 }
 0x1fc   :  { %v295_v7 = vadd.f32 %v294_v6, %v293_v5 }
 0x1fe   :  { %v296_v8 = vrot.slane %v295_v7, 1 }
 0x200   :  { %v297_v9 = vadd.f32 %v296_v8, %v295_v7 }
 0x202   :  { %v298_v10 = vmul.f32 0.25, %v297_v9 }
 0x204   :  { %v299_v11 = vsub.f32 %v285_v1, %v298_v10 }
 0x206   :  { %v300_v12 = vmul.f32 %v299_v11, %v299_v11 }
 0x208   :  { %v301_v13 = vsel %vm165_vm2, %v300_v12, 0.0 }
 0x209   :  { %v302_v14 = vrot.slane %v301_v13, 4 }
 0x20b   :  { %v303_v15 = vadd.f32 %v302_v14, %v301_v13 }
 0x20d   :  { %v304_v16 = vrot.slane %v303_v15, 2 }
 0x20f   :  { %v305_v0 = vadd.f32 %v304_v16, %v303_v15 }
 0x211   :  { %v306_v17 = vrot.slane %v305_v0, 1 }
 0x213   :  { %v307_v18 = vadd.f32 %v306_v17, %v305_v0 }
 0x215   :  { %v308_v19 = vmul.f32 0.25, %v307_v18 }
 0x217   :  { %v309_v20 = vadd.f32 1e-05, %v308_v19 }
 0x219   :  { %569 = vrsqrt.f32 %v309_v20 }
 0x226   :  { %v570_v21 = vpop.eup %569 }
 0x227   :  { %v311_v23 = vmul.f32 %v570_v21, %v299_v11 }
 0x229   :  { %v318_v25 = vmul.f32 %v441_v22, %v311_v23 }
 0x22b   :  { %v325_v26 = vadd.f32 %v442_v24, %v318_v25 }
 0x22d   :  { %v326_v27 = vmax.f32 %v325_v26, 0.0 }
 0x22f   :  { %556 = vmatmul.mubr.f32.vlgmr.msra.gmra.mxu0 %v326_v27 }
 0x2ef   :  { %v416_v29 = vpop.f32.mrf.mxu0 }
 0x2f0   :  { %v417_v30 = vadd.f32 %v443_v28, %v416_v29 }
 0x2f1   :  { %v557_v31 = vpop.f32.mrf.mxu0 }
 0x2f2   :  { %420 = vst [vmem:[#allocation10] sm:$0xf] %v417_v30 }
 0x2f3   :  { %662 = shalt.err (!%p659_p10)
}
 0x2f4   :  { %430 = dma.vmem_to_hbm [thread:$0]  %s428_s15, 64, %s827_s9, [#allocation4]  }
 0x2f5   :  { %677 = dma.done.wait [#allocation4], 64  }
 0x2f6   :  { %678 = vsyncadd [#allocation4], 4294967232 }
 0x2f7   :  { %434 = vsyncpa [#allocation3], 1 }
 0x2f8   :  { %435 = vsyncpa [#allocation6], 1 }
 0x2f9   :  { %436 = vsyncpa [#allocation9], 1 }
 0x2fa   :  { %437 = vsyncpa [#allocation4], 1 }

</bundles_post_ra>
